<compile_context>
chip_gen: v6e
topology: v6e:2x2x1
jax: 0.10.0
libtpu: 0.0.40
codegen_flags: <defaults>
</compile_context>

<pallas_src>
import jax
import jax.numpy as jnp
from jax.experimental import pallas as pl
from jax.experimental.pallas import tpu as pltpu

_LANE = 128
_MAX_COLS = 4096                 # widest lane-dense last dim we try
_MIB = 1024 * 1024
_SMALL_BYTES = 512 * 1024        # per-operand; below this, one whole-array block


def _bitwise_or_kernel(a_ref, b_ref, o_ref):
    # d = a | (a | b) == a | b  -> a single VPU OR per vreg.
    o_ref[...] = a_ref[...] | b_ref[...]


def _vmem_capacity_bytes():
    """Physical per-core VMEM bytes; falls back to the smallest (v7x) value."""
    try:
        return int(pltpu.get_tpu_info().vmem_capacity_bytes)
    except Exception:  # pragma: no cover - defensive
        return 64 * _MIB


def _gen_params():
    cap = _vmem_capacity_bytes()
    if cap <= 96 * _MIB:
        # v7x-like (64 MiB VMEM, ~3.2 TB/s HBM): bigger blocks amortize the
        # fixed per-step cost.  3 arrays x 2 buffers x 6 MiB = 36 MiB <= 48 MiB.
        return {"block_bytes": 6 * _MIB, "vmem_limit": 48 * _MIB}
    # v5e / v6e (128 MiB VMEM): 4 MiB blocks already sit near the HBM roofline.
    # 3 x 2 x 4 MiB = 24 MiB << 96 MiB (explicit, since v5e defaults to 16 MiB).
    return {"block_bytes": 4 * _MIB, "vmem_limit": 96 * _MIB}


def _pick_cols(n_main, sub):
    """Widest power-of-two lane count (<= _MAX_COLS) dividing n_main,
    preferring shapes with >= `sub` rows so vreg sublanes stay fully packed."""
    widest = None
    c = _MAX_COLS
    while c >= _LANE:
        if n_main % c == 0:
            if widest is None:
                widest = c
            if n_main // c >= sub:
                return c
        c //= 2
    return widest if widest is not None else _LANE


def _or_whole(a2, b2):
    """Single whole-array block (no grid) — any 2-D shape is legal."""
    itemsize = jnp.dtype(a2.dtype).itemsize
    cost = pl.CostEstimate(flops=int(a2.size), transcendentals=0,
                           bytes_accessed=3 * int(a2.size) * itemsize)
    return pl.pallas_call(
        _bitwise_or_kernel,
        out_shape=jax.ShapeDtypeStruct(a2.shape, a2.dtype),
        cost_estimate=cost,
    )(a2, b2)


def _or_tiled(a2, b2, *, block_bytes, vmem_limit, sub, donate_a=False):
    """Tiled, parallel 1-D grid over lane-dense multi-MiB row blocks."""
    rows, cols = a2.shape
    itemsize = jnp.dtype(a2.dtype).itemsize
    row_bytes = cols * itemsize

    # Target block rows from the per-generation block-byte budget.
    target_rpb = max(sub, (block_bytes // row_bytes) // sub * sub)
    nb = pl.cdiv(rows, target_rpb)
    if rows >= 2 * sub:
        nb = max(nb, 2)          # keep both v7x TensorCores busy on mid-size inputs
        if nb % 2:
            nb += 1              # even block count -> balanced 2-core split
    rpb = min(rows, ((pl.cdiv(rows, nb) + sub - 1) // sub) * sub)
    grid = (pl.cdiv(rows, rpb),)

    extra = {}
    if donate_a:
        # Output block i is exactly input-a block i and is written only after
        # that block has been consumed, so in-place aliasing is safe.  Only
        # enable when the caller actually donates `a` at the jit boundary.
        extra["input_output_aliases"] = {0: 0}

    cost = pl.CostEstimate(flops=rows * cols, transcendentals=0,
                           bytes_accessed=3 * rows * cols * itemsize)
    return pl.pallas_call(
        _bitwise_or_kernel,
        out_shape=jax.ShapeDtypeStruct((rows, cols), a2.dtype),
        grid_spec=pltpu.PrefetchScalarGridSpec(
            num_scalar_prefetch=0,
            grid=grid,
            in_specs=[
                pl.BlockSpec((rpb, cols), lambda i: (i, 0)),
                pl.BlockSpec((rpb, cols), lambda i: (i, 0)),
            ],
            out_specs=pl.BlockSpec((rpb, cols), lambda i: (i, 0)),
        ),
        compiler_params=pltpu.CompilerParams(
            dimension_semantics=("parallel",),
            vmem_limit_bytes=vmem_limit,
        ),
        cost_estimate=cost,
        **extra,
    )(a2, b2)


def simple_bitwise_or(a, b, *, donate_a=False):
    """Elementwise d = a | (a | b) for same-shape, same-dtype integer/bool tensors."""
    # TODO(synk): PyTorch broadcasting / mixed-dtype promotion is not covered;
    # the module contract exercised here is the same-shape, same-dtype case.
    assert a.shape == b.shape, "this wrapper implements the same-shape case"
    assert a.dtype == b.dtype
    orig_shape = a.shape
    n = a.size
    if n == 0:
        return a | b

    itemsize = jnp.dtype(a.dtype).itemsize
    sub = max(8, 32 // itemsize)          # 8 rows (32-bit), 16 (16-bit), 32 (8-bit/bool)
    params = _gen_params()

    a_flat = a.reshape(-1)
    b_flat = b.reshape(-1)

    # Split into a 128-lane-aligned main part (through the Pallas kernel) and a
    # <128-element tail.  No full-array pad / output slice: on this purely
    # HBM-bound op those added ~2 extra full passes over the data.
    n_main = (n // _LANE) * _LANE
    n_tail = n - n_main

    outs = []
    if n_main > 0:
        if n_tail == 0:
            a_main, b_main = a_flat, b_flat
        else:
            a_main, b_main = a_flat[:n_main], b_flat[:n_main]
        cols = _pick_cols(n_main, sub)
        rows = n_main // cols
        a2 = a_main.reshape(rows, cols)
        b2 = b_main.reshape(rows, cols)
        if n_main * itemsize <= _SMALL_BYTES:
            o2 = _or_whole(a2, b2)
        else:
            o2 = _or_tiled(a2, b2,
                           block_bytes=params["block_bytes"],
                           vmem_limit=params["vmem_limit"],
                           sub=sub,
                           donate_a=donate_a and n_tail == 0)
        outs.append(o2.reshape(-1))
    if n_tail > 0:
        # <=127 leftover elements: not worth a kernel launch; plain XLA OR.
        outs.append(a_flat[n_main:] | b_flat[n_main:])

    out_flat = outs[0] if len(outs) == 1 else jnp.concatenate(outs)
    return out_flat.reshape(orig_shape)


if __name__ == "__main__":
    key = jax.random.PRNGKey(0)
    k1, k2, k3, k4, k5, k6 = jax.random.split(key, 6)

    or_fn = jax.jit(simple_bitwise_or)

    # Module-consistent small NCHW input (single whole-array block path).
    shape = (2, 4, 16, 16)
    a = jax.random.randint(k1, shape, minval=-(2**30), maxval=2**30, dtype=jnp.int32)
    b = jax.random.randint(k2, shape, minval=-(2**30), maxval=2**30, dtype=jnp.int32)
    ref = a | (a | b)
    out = jax.block_until_ready(or_fn(a, b))
    assert out.shape == shape and out.dtype == jnp.int32
    assert bool(jnp.all(out == ref))

    # Larger input: tiled, even-length "parallel" grid path.
    shape_big = (8, 16, 128, 128)
    a_big = jax.random.randint(k3, shape_big, minval=-(2**30), maxval=2**30, dtype=jnp.int32)
    b_big = jax.random.randint(k4, shape_big, minval=-(2**30), maxval=2**30, dtype=jnp.int32)
    ref_big = a_big | (a_big | b_big)
    out_big = jax.block_until_ready(or_fn(a_big, b_big))
    assert bool(jnp.all(out_big == ref_big))

    # Ragged element count (not a multiple of 128): aligned prefix through the
    # kernel + tiny tail via plain XLA, no full-array pad/slice.
    shape_r = (7, 13, 5)
    a_r = jax.random.randint(k5, shape_r, minval=-(2**30), maxval=2**30, dtype=jnp.int32)
    b_r = jax.random.randint(k6, shape_r, minval=-(2**30), maxval=2**30, dtype=jnp.int32)
    ref_r = a_r | (a_r | b_r)
    out_r = jax.block_until_ready(or_fn(a_r, b_r))
    assert bool(jnp.all(out_r == ref_r))

    print("KERNEL_OK")
</pallas_src>

<mosaic_0001>
module attributes {stable_mosaic.version = 11 : i64} {
  func.func @_bitwise_or_kernel(%arg0: memref<8x256xi32, #tpu.memory_space<vmem>>, %arg1: memref<8x256xi32, #tpu.memory_space<vmem>>, %arg2: memref<8x256xi32, #tpu.memory_space<vmem>>) attributes {dimension_semantics = [], scalar_prefetch = 0 : i64, scratch_operands = 0 : i64, tpu.core_type = #tpu.core_type<tc>} {
    %c0 = arith.constant 0 : index
    %c0_0 = arith.constant 0 : index
    %0 = vector.load %arg0[%c0, %c0_0] : memref<8x256xi32, #tpu.memory_space<vmem>>, vector<8x256xi32>
    %c0_1 = arith.constant 0 : index
    %c0_2 = arith.constant 0 : index
    %1 = vector.load %arg1[%c0_1, %c0_2] : memref<8x256xi32, #tpu.memory_space<vmem>>, vector<8x256xi32>
    %2 = arith.ori %0, %1 : vector<8x256xi32>
    %c0_3 = arith.constant 0 : index
    %c0_4 = arith.constant 0 : index
    %3 = vector.load %arg2[%c0_3, %c0_4] : memref<8x256xi32, #tpu.memory_space<vmem>>, vector<8x256xi32>
    tpu.vector_store %arg2[%c0_3, %c0_4], %2 {strides = array<i32>} : memref<8x256xi32, #tpu.memory_space<vmem>>, vector<8x256xi32>,
    return
  }
}

</mosaic_0001>

<bundles_post_ra>
// kernel: simple_bitwise_or.1
= control target key start
LH: loop header
LB: loop body
LE: loop exit
PB: predicated region body
PF: predicated region fallthrough
CT: control target
= control target key end

     0   :  { %s56_s0 = inlined_call_operand.vmem [shape: s32[8,256], index: 0, kind: input, shape index: {}]   ;;  %s57_s1 = inlined_call_operand.vmem [shape: s32[8,256], index: 1, kind: input, shape index: {}]   ;;  %s58_s2 = inlined_call_operand.vmem [shape: s32[8,256], index: 2, kind: output, shape index: {}]  }
   0x1   :  { %v11_v0 = vld [vmem:[%s56_s0] sm:$0xff]  ;;  %v12_v2 = vld [vmem:[%s56_s0 + $0x8] sm:$0xff] }
   0x2   :  { %v13_v1 = vld [vmem:[%s57_s1] sm:$0xff]  ;;  %v14_v4 = vld [vmem:[%s57_s1 + $0x8] sm:$0xff] }
   0x3   :  { %v15_v3 = vor.u32 %v13_v1, %v11_v0  ;;  %v16_v5 = vor.u32 %v14_v4, %v12_v2 }
   0x5   :  { %17 = vst [vmem:[%s58_s2] sm:$0xff] %v15_v3  ;;  %18 = vst [vmem:[%s58_s2 + $0x8] sm:$0xff] %v16_v5 }

</bundles_post_ra>
